<compile_context>
chip_gen: v6e
topology: v6e:2x2x1
jax: 0.10.0
libtpu: 0.0.40
codegen_flags: <defaults>
</compile_context>

<pallas_src>
import functools
import math

import jax
import jax.numpy as jnp
from jax.experimental import pallas as pl
from jax.experimental.pallas import tpu as pltpu


def _hamming_kernel(a_ref, b_ref, o_ref, *, tile_f, f_row, n_tiles,
                    tiles_per_chunk, needs_mask, needs_range_check,
                    acc_dtype, unroll):
    p = pl.program_id(0)          # parallel feature-chunk axis (megacore)
    k = pl.program_id(1)          # reduction axis within the chunk
    tile_idx = p * tiles_per_chunk + k

    # The output block is resident across k -> it IS the accumulator.
    @pl.when(k == 0)
    def _():
        o_ref[...] = jnp.zeros_like(o_ref)

    rows = o_ref.shape[0]
    n_groups = tile_f // 128      # tile_f is always a multiple of 128

    def accumulate(masked):
        # Hoisted iota (only traced on the masked branch; not re-broadcast
        # per loop iteration).
        lane = (jax.lax.broadcasted_iota(jnp.int32, (rows, 128), 1)
                if masked else None)

        def body(j, partial):
            col0 = pl.multiple_of(j * 128, 128)
            a = a_ref[:, pl.ds(col0, 128)].astype(acc_dtype)
            b = b_ref[:, pl.ds(col0, 128)].astype(acc_dtype)
            d = jnp.abs(a - b)
            if masked:
                col = tile_idx * tile_f + col0 + lane
                d = jnp.where(col < f_row, d, 0)
            return partial + d

        partial = jax.lax.fori_loop(
            0, n_groups, body,
            jnp.zeros((rows, 128), acc_dtype),
            unroll=min(unroll, n_groups))
        o_ref[...] += partial

    if needs_mask:
        # Only the single overhanging tile pays for the mask.
        @pl.when(tile_idx < n_tiles - 1)
        def _():
            accumulate(masked=False)

        @pl.when(tile_idx == n_tiles - 1)
        def _():
            accumulate(masked=True)
    elif needs_range_check:
        # Uneven 2-way split: skip the duplicate (clamped) trailing step.
        @pl.when(tile_idx < n_tiles)
        def _():
            accumulate(masked=False)
    else:
        accumulate(masked=False)


def _sublane_tile(dtype):
    return {4: 8, 2: 16, 1: 32}.get(jnp.dtype(dtype).itemsize, 8)


def _row_split(n_rows, n_cols, sublane):
    """Smallest S with (n_rows*S) % sublane == 0 and n_cols % S == 0.

    Falls back to the best divisor of n_cols that is <= the needed factor
    (partial sublane fill), or 1.
    """
    need = sublane // math.gcd(n_rows, sublane)
    if need == 1:
        return 1
    if n_cols % need == 0:
        return need
    for s in range(min(need, n_cols), 1, -1):
        if n_cols % s == 0:
            return s
    return 1


def _vmem_limit_bytes():
    # ~half of physical VMEM: 64 MiB on v5e/v6e (128 MiB parts), 32 MiB on
    # v7x (64 MiB per TC).  Falls back conservatively if the query fails.
    try:
        cap = int(pltpu.get_tpu_info().vmem_capacity_bytes)
    except Exception:
        cap = 64 * 1024 * 1024
    return int(min(64 * 2**20, max(32 * 2**20, cap // 2)))


def hamming_distance(i_fm1, i_fm2, *, tile_f=None, buffer_count=3):
    assert i_fm1.shape == i_fm2.shape
    B = i_fm1.shape[0]
    F = 1
    for d in i_fm1.shape[1:]:
        F *= d

    dtype = i_fm1.dtype
    itemsize = jnp.dtype(dtype).itemsize
    is_int = jnp.issubdtype(dtype, jnp.integer) or jnp.issubdtype(dtype, jnp.bool_)
    acc_dtype = jnp.int32 if is_int else jnp.float32

    # Sublane-filling reshape (contiguous -> no data movement, no pad).
    sublane = _sublane_tile(dtype)
    S = _row_split(B, F, sublane)
    rows = B * S
    f_row = F // S
    a = i_fm1.reshape(rows, f_row)
    b = i_fm2.reshape(rows, f_row)

    rows_padded = ((rows + sublane - 1) // sublane) * sublane
    f_pad128 = max(128, ((f_row + 127) // 128) * 128)

    # Size the feature tile from the VMEM budget with exact (padded) footprint
    # math: 2 inputs x buffer_count pipeline buffers, ~70% of the scoped limit.
    vmem_limit = _vmem_limit_bytes()
    block_budget = int(vmem_limit * 0.7) // (2 * max(2, buffer_count))
    cap = max(128, (block_budget // max(1, rows_padded * itemsize)) // 128 * 128)
    tf = cap if tile_f is None else max(128, (int(tile_f) // 128) * 128)
    tf = min(tf, cap, f_pad128)

    n_tiles = pl.cdiv(f_row, tf)
    needs_mask = (f_row % tf) != 0

    # Always 2-way split the reduction when there is more than one tile so a
    # v7x megacore can shard it (neutral on single-TC v5e/v6e).  Odd counts
    # use a clamped index_map + pl.when skip.
    n_par = 2 if n_tiles >= 2 else 1
    tiles_per_chunk = pl.cdiv(n_tiles, n_par)
    needs_range_check = (n_par * tiles_per_chunk) != n_tiles

    def in_index_map(p, k):
        idx = p * tiles_per_chunk + k
        if needs_range_check:
            idx = jnp.minimum(idx, n_tiles - 1)
        return (0, idx)

    kern = functools.partial(
        _hamming_kernel,
        tile_f=tf, f_row=f_row, n_tiles=n_tiles,
        tiles_per_chunk=tiles_per_chunk,
        needs_mask=needs_mask, needs_range_check=needs_range_check,
        acc_dtype=acc_dtype, unroll=8)

    def build(extra_spec_kwargs):
        in_spec = pl.BlockSpec((rows, tf), in_index_map, **extra_spec_kwargs)
        return pl.pallas_call(
            kern,
            out_shape=jax.ShapeDtypeStruct((rows, n_par * 128), acc_dtype),
            grid_spec=pltpu.PrefetchScalarGridSpec(
                num_scalar_prefetch=0,
                grid=(n_par, tiles_per_chunk),
                in_specs=[in_spec, in_spec],
                out_specs=pl.BlockSpec((rows, 128), lambda p, k: (0, p)),
            ),
            compiler_params=pltpu.CompilerParams(
                dimension_semantics=("parallel", "arbitrary"),
                vmem_limit_bytes=vmem_limit,
            ),
        )

    # Deeper input pipelining hides per-step bookkeeping behind the i+2 fetch;
    # fall back to the default double buffer if this build rejects it.
    try:
        partials = build(dict(pipeline_mode=pl.Buffered(buffer_count)))(a, b)
    except Exception:
        partials = build({})(a, b)

    # Tiny final fold: S row-splits and n_par*128 lane partials -> (B,).
    hd = jnp.sum(partials.reshape(B, -1), axis=1)
    # TODO(synk): torch promotes integer sums to int64; kept int32 on TPU (x64 off).
    return hd if is_int else hd.astype(dtype)


if __name__ == "__main__":
    key = jax.random.PRNGKey(0)
    keys = jax.random.split(key, 10)

    def ref_hd(x1, x2):
        d = jnp.abs(x1.astype(jnp.float32) - x2.astype(jnp.float32))
        return jnp.sum(d.reshape(x1.shape[0], -1), axis=1)

    # Case 1: NCHW f32, F=1024 -> sublane-filled (8, 256) layout, single tile.
    x1 = jax.random.normal(keys[0], (2, 4, 16, 16), dtype=jnp.float32)
    x2 = jax.random.normal(keys[1], (2, 4, 16, 16), dtype=jnp.float32)
    out1 = hamming_distance(x1, x2)
    jax.block_until_ready(out1)
    assert out1.shape == (2,)
    assert jnp.allclose(out1, ref_hd(x1, x2), rtol=1e-4, atol=1e-2)

    # Case 2: ragged feature count (F=105) -> in-kernel tail mask.
    y1 = jax.random.normal(keys[2], (2, 3, 7, 5), dtype=jnp.float32)
    y2 = jax.random.normal(keys[3], (2, 3, 7, 5), dtype=jnp.float32)
    out2 = hamming_distance(y1, y2)
    assert jnp.allclose(out2, ref_hd(y1, y2), rtol=1e-4, atol=1e-2)

    # Case 3: multi-tile reduction, even 2-way parallel split, masked tail tile.
    z1 = jax.random.normal(keys[4], (2, 10, 10, 10), dtype=jnp.float32)
    z2 = jax.random.normal(keys[5], (2, 10, 10, 10), dtype=jnp.float32)
    out3 = hamming_distance(z1, z2, tile_f=128)
    assert jnp.allclose(out3, ref_hd(z1, z2), rtol=1e-4, atol=1e-2)

    # Case 4: odd tile count -> uneven megacore split with clamped index_map.
    w1 = jax.random.normal(keys[6], (2, 12, 16, 16), dtype=jnp.float32)
    w2 = jax.random.normal(keys[7], (2, 12, 16, 16), dtype=jnp.float32)
    out4 = hamming_distance(w1, w2, tile_f=256)
    assert jnp.allclose(out4, ref_hd(w1, w2), rtol=1e-4, atol=1e-2)

    # Case 5: bf16 inputs (16-row sublane tile).
    b1 = jax.random.normal(keys[8], (2, 4, 16, 16), jnp.float32).astype(jnp.bfloat16)
    b2 = jax.random.normal(keys[9], (2, 4, 16, 16), jnp.float32).astype(jnp.bfloat16)
    out5 = hamming_distance(b1, b2)
    ref5 = ref_hd(b1, b2)
    assert jnp.allclose(out5.astype(jnp.float32), ref5, rtol=2e-2)

    # Case 6: integer inputs -> exact int32 accumulation.
    i1 = jax.random.randint(keys[0], (2, 4, 8, 8), 0, 16, dtype=jnp.int32)
    i2 = jax.random.randint(keys[1], (2, 4, 8, 8), 0, 16, dtype=jnp.int32)
    out6 = hamming_distance(i1, i2)
    ref6 = jnp.sum(jnp.abs(i1 - i2).reshape(2, -1), axis=1)
    assert jnp.array_equal(out6, ref6)

    jax.block_until_ready((out1, out2, out3, out4, out5, out6))
    print("KERNEL_OK")
</pallas_src>

<mosaic_0001>
module attributes {stable_mosaic.version = 11 : i64} {
  func.func @_hamming_kernel(%arg0: i32, %arg1: i32, %arg2: memref<8x256xf32, #tpu.memory_space<vmem>>, %arg3: memref<8x256xf32, #tpu.memory_space<vmem>>, %arg4: memref<8x128xf32, #tpu.memory_space<vmem>>) attributes {dimension_semantics = [#tpu.dimension_semantics<parallel>, #tpu.dimension_semantics<arbitrary>], iteration_bounds = array<i64: 1, 1>, scalar_prefetch = 0 : i64, scratch_operands = 0 : i64, tpu.core_type = #tpu.core_type<tc>, window_params = [{transform_indices = @transform_0, window_bounds = array<i64: 8, 256>}, {transform_indices = @transform_1, window_bounds = array<i64: 8, 256>}, {transform_indices = @transform_2, window_bounds = array<i64: 8, 128>}]} {
    %c0_i32 = arith.constant 0 : i32
    %0 = arith.cmpi eq, %arg1, %c0_i32 : i32
    %1 = arith.extui %0 : i1 to i32
    %c0_i32_0 = arith.constant 0 : i32
    %2 = arith.cmpi ne, %1, %c0_i32_0 : i32
    scf.if %2 {
      %cst_10 = arith.constant 0.000000e+00 : f32
      %25 = vector.broadcast %cst_10 : f32 to vector<8x128xf32>
      %c0_11 = arith.constant 0 : index
      %c0_12 = arith.constant 0 : index
      %26 = vector.load %arg4[%c0_11, %c0_12] : memref<8x128xf32, #tpu.memory_space<vmem>>, vector<8x128xf32>
      tpu.vector_store %arg4[%c0_11, %c0_12], %25 {strides = array<i32>} : memref<8x128xf32, #tpu.memory_space<vmem>>, vector<8x128xf32>,
    } else {
    }
    %cst = arith.constant 0.000000e+00 : f32
    %3 = vector.broadcast %cst : f32 to vector<8x128xf32>
    %c0_i32_1 = arith.constant 0 : i32
    %c128_i32 = arith.constant 128 : i32
    %4 = arith.muli %c0_i32_1, %c128_i32 : i32
    %5 = tpu.assume_multiple %4, 128 : i32
    %c0 = arith.constant 0 : index
    %6 = arith.index_cast %5 : i32 to index
    %7 = vector.load %arg2[%c0, %6] : memref<8x256xf32, #tpu.memory_space<vmem>>, vector<8x128xf32>
    %c0_2 = arith.constant 0 : index
    %8 = arith.index_cast %5 : i32 to index
    %9 = vector.load %arg3[%c0_2, %8] : memref<8x256xf32, #tpu.memory_space<vmem>>, vector<8x128xf32>
    %10 = arith.subf %7, %9 : vector<8x128xf32>
    %11 = math.absf %10 : vector<8x128xf32>
    %12 = arith.addf %3, %11 : vector<8x128xf32>
    %c1_i32 = arith.constant 1 : i32
    %c128_i32_3 = arith.constant 128 : i32
    %13 = arith.muli %c1_i32, %c128_i32_3 : i32
    %14 = tpu.assume_multiple %13, 128 : i32
    %c0_4 = arith.constant 0 : index
    %15 = arith.index_cast %14 : i32 to index
    %16 = vector.load %arg2[%c0_4, %15] : memref<8x256xf32, #tpu.memory_space<vmem>>, vector<8x128xf32>
    %c0_5 = arith.constant 0 : index
    %17 = arith.index_cast %14 : i32 to index
    %18 = vector.load %arg3[%c0_5, %17] : memref<8x256xf32, #tpu.memory_space<vmem>>, vector<8x128xf32>
    %19 = arith.subf %16, %18 : vector<8x128xf32>
    %20 = math.absf %19 : vector<8x128xf32>
    %21 = arith.addf %12, %20 : vector<8x128xf32>
    %c2_i32 = arith.constant 2 : i32
    %c0_6 = arith.constant 0 : index
    %c0_7 = arith.constant 0 : index
    %22 = vector.load %arg4[%c0_6, %c0_7] : memref<8x128xf32, #tpu.memory_space<vmem>>, vector<8x128xf32>
    %23 = arith.addf %22, %21 : vector<8x128xf32>
    %c0_8 = arith.constant 0 : index
    %c0_9 = arith.constant 0 : index
    %24 = vector.load %arg4[%c0_8, %c0_9] : memref<8x128xf32, #tpu.memory_space<vmem>>, vector<8x128xf32>
    tpu.vector_store %arg4[%c0_8, %c0_9], %23 {strides = array<i32>} : memref<8x128xf32, #tpu.memory_space<vmem>>, vector<8x128xf32>,
    return
  }
  func.func @transform_0(%arg0: i32, %arg1: i32) -> (i32, i32) {
    %c1_i32 = arith.constant 1 : i32
    %0 = arith.muli %arg0, %c1_i32 : i32
    %1 = arith.addi %0, %arg1 : i32
    %c0_i32 = arith.constant 0 : i32
    %c0_i32_0 = arith.constant 0 : i32
    return %c0_i32, %1 : i32, i32
  }
  func.func @transform_1(%arg0: i32, %arg1: i32) -> (i32, i32) {
    %c1_i32 = arith.constant 1 : i32
    %0 = arith.muli %arg0, %c1_i32 : i32
    %1 = arith.addi %0, %arg1 : i32
    %c0_i32 = arith.constant 0 : i32
    %c0_i32_0 = arith.constant 0 : i32
    return %c0_i32, %1 : i32, i32
  }
  func.func @transform_2(%arg0: i32, %arg1: i32) -> (i32, i32) {
    %c0_i32 = arith.constant 0 : i32
    %c0_i32_0 = arith.constant 0 : i32
    return %c0_i32, %arg0 : i32, i32
  }
}

</mosaic_0001>

<bundles_post_ra>
// kernel: tpu_custom_call.1
= control target key start
LH: loop header
LB: loop body
LE: loop exit
PB: predicated region body
PF: predicated region fallthrough
CT: control target
= control target key end

     0   :  { %7 = vsyncpa [#allocation3], 0  ;;  %s181_s0 = inlined_call_operand.hbm [shape: f32[8,256], index: 0, kind: input, shape index: {}]   ;;  %s182_s1 = inlined_call_operand.hbm [shape: f32[8,256], index: 1, kind: input, shape index: {}]   ;;  %s183_s2 = inlined_call_operand.hbm [shape: f32[8,128], index: 2, kind: output, shape index: {}]  }
   0x1   :  { %8 = vsyncpa [#allocation6], 0 }
   0x2   :  { %9 = vsyncpa [#allocation4], 0  ;;  %s154_s9 = smov [#allocation2]   ;;  %s155_s11 = smov [#allocation5]  }
   0x3   :  { %s20_s10 = sshll.u32 %s154_s9, 4  ;;  %s34_s12 = sshll.u32 %s155_s11, 4  ;;  %s21_s10 = int_to_ptr.vmem [resolvable:$true] %s20_s10  ;;  %s35_s12 = int_to_ptr.vmem [resolvable:$true] %s34_s12 }
   0x4   :  { %s96_s13 = scalar_lea.vmem %s21_s10, 256  ;;  %p101_p1 = scmp.lt.s32.totalorder %s21_s10, %s21_s10 }
   0x5   :  { %p97_p0 = scmp.ne.s32.totalorder %s21_s10, %s96_s13  ;;  %p102_p2 = scmp.lt.s32.totalorder %s96_s13, %s96_s13 }
   0x7   :  { %p103_p3 = por %p102_p2, %p101_p1 }
   0x9   :  { %p104_p4 = pnand %p103_p3, %p97_p0 }
   0xb   :  { %107 = shalt.err (!%p104_p4)
}
   0xc   :  { %23 = dma.hbm_to_vmem [thread:$0]  %s181_s0, 256, %s21_s10, [#allocation3]  }
   0xd   :  { %s116_s16 = scalar_lea.vmem %s35_s12, 256  ;;  %p121_p6 = scmp.lt.s32.totalorder %s35_s12, %s35_s12 }
   0xe   :  { %p117_p5 = scmp.ne.s32.totalorder %s35_s12, %s116_s16  ;;  %p122_p7 = scmp.lt.s32.totalorder %s116_s16, %s116_s16 }
  0x10   :  { %p123_p8 = por %p122_p7, %p121_p6 }
  0x12   :  { %p124_p9 = pnand %p123_p8, %p117_p5 }
  0x14   :  { %127 = shalt.err (!%p124_p9)
}
  0x15   :  { %37 = dma.hbm_to_vmem [thread:$0]  %s182_s1, 256, %s35_s12, [#allocation6]  }
  0x16   :  { %148 = dma.done.wait [#allocation3], 256  }
  0x17   :  { %149 = vsyncadd [#allocation3], 4294967040 }
  0x18   :  { %150 = dma.done.wait [#allocation6], 256  }
  0x19   :  { %151 = vsyncadd [#allocation6], 4294967040  ;;  %v53_v0 = vld [vmem:[#allocation2] sm:$0xff]  ;;  %v54_v1 = vld [vmem:[#allocation5] sm:$0xff]  ;;  %s156_s0 = smov [#allocation7]  }
  0x1a   :  { %v59_v2 = vld [vmem:[#allocation2 + $0x8] sm:$0xff]  ;;  %v55_v3 = vsub.f32 %v53_v0, %v54_v1  ;;  %v61_v4 = vld [vmem:[#allocation5 + $0x8] sm:$0xff]  ;;  %s74_s19 = sshll.u32 %s156_s0, 4  ;;  %s75_s19 = int_to_ptr.vmem [resolvable:$true] %s74_s19 }
  0x1b   :  { %v62_v5 = vsub.f32 %v59_v2, %v61_v4  ;;  %s128_s20 = scalar_lea.vmem %s75_s19, 128  ;;  %p133_p11 = scmp.lt.s32.totalorder %s75_s19, %s75_s19 }
  0x1c   :  { %v56_v6 = vand.u32 2147483647, %v55_v3  ;;  %p129_p10 = scmp.ne.s32.totalorder %s75_s19, %s128_s20  ;;  %p134_p12 = scmp.lt.s32.totalorder %s128_s20, %s128_s20 }
  0x1d   :  { %v63_v7 = vand.u32 2147483647, %v62_v5 }
  0x1e   :  { %p135_p13 = por %p134_p12, %p133_p11 }
  0x1f   :  { %v64_v8 = vadd.f32 %v63_v7, %v56_v6 }
  0x20   :  { %p136_p0 = pnand %p135_p13, %p129_p10 }
  0x21   :  { %67 = vst [vmem:[#allocation7] sm:$0xff] %v64_v8 }
  0x22   :  { %139 = shalt.err (!%p136_p0)
}
  0x23   :  { %77 = dma.vmem_to_hbm [thread:$0]  %s75_s19, 128, %s183_s2, [#allocation4]  }
  0x24   :  { %152 = dma.done.wait [#allocation4], 128  }
  0x25   :  { %153 = vsyncadd [#allocation4], 4294967168 }
  0x26   :  { %81 = vsyncpa [#allocation3], 1 }
  0x27   :  { %82 = vsyncpa [#allocation6], 1 }
  0x28   :  { %83 = vsyncpa [#allocation4], 1 }

</bundles_post_ra>
